<compile_context>
chip_gen: v6e
topology: v6e:2x2x1
jax: 0.10.0
libtpu: 0.0.40
codegen_flags: <defaults>
</compile_context>

<pallas_src>
import functools
import math

import numpy as np
import jax
import jax.numpy as jnp
from jax.experimental import pallas as pl
from jax.experimental.pallas import tpu as pltpu

_LANE = 128
_SUBLANE = 8
_PAD_CLS = -2          # sentinel class id for padding rows (real labels are >= -1)


def _round_up(x, m):
    return (x + m - 1) // m * m


# ---------------------------------------------------------------------------
# Fused kernel: loss1 (augmentation NT-Xent) + loss2 (class contrastive), tiled
# over row blocks of the similarity matrix.  Lane-dense (1, N) accumulators.
# ---------------------------------------------------------------------------
def _fused_loss_kernel(z_ref, cls_row_ref, cls_col_ref, zsq_ref, p1_ref, out_ref,
                       d1_ref, d2_ref, p2_ref,
                       *, tm, n_real, inv_t, coeff, exp_neg_t, pad_corr):
    blk = pl.program_id(0)
    nblk = pl.num_programs(0)

    @pl.when(blk == 0)
    def _init():
        d1_ref[...] = jnp.zeros_like(d1_ref)
        d2_ref[...] = jnp.zeros_like(d2_ref)
        p2_ref[...] = jnp.zeros_like(p2_ref)

    # ---- per-row-block work --------------------------------------------------
    row0 = pl.multiple_of(blk * tm, _SUBLANE)
    zb = z_ref[pl.ds(row0, tm), :]                                   # (tm, d_pad) bf16
    # cosine-similarity slab: rows are unit-norm -> A.B^T on the MXU (standard
    # q.k^T contraction, no RHS transpose), f32 accumulation.
    sim = jax.lax.dot_general(zb, z_ref[...], (((1,), (1,)), ((), ())),
                              preferred_element_type=jnp.float32)    # (tm, n_pad)

    crow = cls_col_ref[pl.ds(row0, tm), :]                           # (tm, 1) i32
    ccol = cls_row_ref[...]                                          # (1, n_pad) i32
    same_b = crow == ccol                                            # (tm, n_pad) bool

    # single shifted exp: exp((sim - 1)/T) <= ~1, overflow-free for any T
    e = jnp.exp((sim - 1.0) * inv_t)

    # loss1 denominator column sums: unmasked; the diagonal term exp((zsq-1)/T)
    # and the constant padding-row contribution are subtracted at finalize.
    d1_ref[...] += jnp.sum(e, axis=0, keepdims=True)

    # loss2 denominator column sums (shifted): same-class -> exp(-1/T), else e;
    # only labelled rows (cls >= 0) contribute.  Unlabelled/pad columns are
    # discarded at finalize, so their accumulated values are irrelevant.
    d2_val = jnp.where(same_b, exp_neg_t, e)
    d2_ref[...] += jnp.sum(jnp.where(crow >= 0, d2_val, 0.0), axis=0, keepdims=True)

    # loss2 positives column sums: for a labelled column only labelled rows can
    # match its class, so no explicit row mask is needed; the diagonal (i == j)
    # contribution is removed at finalize via zsq.
    p2_ref[...] += jnp.sum(jnp.where(same_b, sim, 0.0), axis=0, keepdims=True)

    # ---- finalize (last block): O(N) logs/reduces + scalar combine ------------
    @pl.when(blk == nblk - 1)
    def _finalize():
        col = cls_row_ref[...]
        col_real = col > _PAD_CLS                                    # non-padding columns
        col_valid = col >= 0                                         # labelled columns
        zsq = zsq_ref[...]                                           # (1, n_pad) f32

        # loss1 (augmentation NT-Xent); log(den_j) = 1/T + log(d1_j_shifted)
        diag1 = jnp.exp((zsq - 1.0) * inv_t)
        d1 = d1_ref[...] - diag1 - pad_corr
        log_d1 = jnp.log(jnp.where(col_real, d1, 1.0))
        loss1 = (inv_t * (n_real - p1_ref[...]) + jnp.sum(log_d1)) / (2.0 * n_real)

        # loss2 (class contrastive); log(den2_j) = 1/T + log(d2_j_shifted)
        n_valid = jnp.sum(jnp.where(col_valid, 1.0, 0.0))            # 2M (may be 0)
        log_d2 = jnp.log(jnp.where(col_valid, d2_ref[...], 1.0))
        p2 = jnp.sum(jnp.where(col_valid, p2_ref[...] - zsq, 0.0))
        loss2 = (-p2 * inv_t + n_valid * (n_valid * inv_t + jnp.sum(log_d2))
                 ) / jnp.maximum(2.0 * n_valid, 1.0)
        loss2 = jnp.where(n_valid > 0.5, loss2, 0.0)

        out_ref[...] = loss1 + coeff * loss2


# ---------------------------------------------------------------------------
# Wrapper: fully jit-traceable, no host-side filtering.
# ---------------------------------------------------------------------------
def contrastive_loss(emb_i, emb_j, predicted_cls, temperature=0.5,
                     balancing_coeff=0.01):
    """Pallas TPU implementation of ContrastiveLoss.forward (jit-traceable).

    temperature / balancing_coeff must be static Python numbers (constant buffers
    in the original nn.Module).
    """
    b, d = emb_i.shape
    n = 2 * b
    d_pad = _round_up(max(d, 1), _LANE)
    inv_t = float(1.0 / temperature)
    exp_neg_t = float(math.exp(-inv_t))

    # ---- hardware-aware tile & VMEM budget -----------------------------------
    try:
        vmem_cap = int(pltpu.get_tpu_info().vmem_capacity_bytes)
    except Exception:
        vmem_cap = 64 * 1024 * 1024          # conservative fallback (v7x per-TC VMEM)

    def _vmem_est(tm_):
        np_ = _round_up(n, tm_)
        return (2 * np_ * d_pad * 2          # resident bf16 Z (double-buffered BlockSpec)
                + 6 * tm_ * np_ * 4          # live (tm, n_pad) f32 slabs (sim/e/selects)
                + 2 * np_ * (512 + 3 * 32)   # lane-padded cls_col + cls_row/zsq/accum
                + (2 << 20))                 # headroom

    n8 = _round_up(n, _SUBLANE)
    if n8 <= 512:
        tm = n8                              # single row block
    else:
        tm = 128
        for cand in (512, 256):              # 512 on v5e/v6e (128 MiB); smaller on v7x
            if _vmem_est(cand) <= vmem_cap - (8 << 20):
                tm = cand
                break
    n_pad = _round_up(n, tm)
    nblk = n_pad // tm
    vmem_limit = int(min(max(_vmem_est(tm), 16 << 20), vmem_cap))

    # ---- wrapper-side (XLA) preprocessing: all O(N*D) --------------------------
    r = jnp.concatenate([emb_i, emb_j], axis=0).astype(jnp.float32)
    inv_norm = jax.lax.rsqrt(
        jnp.maximum(jnp.sum(r * r, axis=1, keepdims=True), 1e-24))   # == 1/max(||x||,1e-12)
    zb16 = (r * inv_norm).astype(jnp.bfloat16)                       # what the MXU sees
    zf = zb16.astype(jnp.float32)
    p1 = 2.0 * jnp.sum(zf[:b] * zf[b:])                              # sum of aug positives
    zsq = jnp.sum(zf * zf, axis=1)                                   # == MXU sim diagonal

    z_pad = jnp.pad(zb16, ((0, n_pad - n), (0, d_pad - d)))          # zero pad: harmless
    zsq_pad = jnp.pad(zsq, (0, n_pad - n)).reshape(1, n_pad)
    p1_arr = p1.reshape(1, 1).astype(jnp.float32)

    cls = jnp.asarray(predicted_cls).astype(jnp.int32).reshape(b)
    cls_full = jnp.pad(jnp.concatenate([cls, cls], axis=0), (0, n_pad - n),
                       constant_values=_PAD_CLS)
    cls_row = cls_full.reshape(1, n_pad)                             # lane-oriented
    cls_col = cls_full.reshape(n_pad, 1)                             # sublane-oriented

    kernel = functools.partial(
        _fused_loss_kernel, tm=tm, n_real=float(n), inv_t=inv_t,
        coeff=float(balancing_coeff), exp_neg_t=exp_neg_t,
        pad_corr=float((n_pad - n) * exp_neg_t))

    out = pl.pallas_call(
        kernel,
        out_shape=jax.ShapeDtypeStruct((1, 1), jnp.float32),
        grid=(nblk,),
        in_specs=[pl.BlockSpec((n_pad, d_pad), lambda i: (0, 0)),    # Z bf16 (resident)
                  pl.BlockSpec((1, n_pad), lambda i: (0, 0)),        # classes (lane)
                  pl.BlockSpec((n_pad, 1), lambda i: (0, 0)),        # classes (sublane)
                  pl.BlockSpec((1, n_pad), lambda i: (0, 0)),        # ||z_bf16||^2 per row
                  pl.BlockSpec((1, 1), lambda i: (0, 0))],           # p1 (aug positives)
        out_specs=pl.BlockSpec((1, 1), lambda i: (0, 0)),
        scratch_shapes=[pltpu.VMEM((1, n_pad), jnp.float32),         # loss1 den column sums
                        pltpu.VMEM((1, n_pad), jnp.float32),         # loss2 den column sums
                        pltpu.VMEM((1, n_pad), jnp.float32)],        # loss2 pos column sums
        compiler_params=pltpu.CompilerParams(
            dimension_semantics=("arbitrary",),                      # sequential accumulation
            vmem_limit_bytes=vmem_limit),
        cost_estimate=pl.CostEstimate(
            flops=2 * n_pad * n_pad * d_pad + 10 * n_pad * n_pad,
            transcendentals=n_pad * n_pad + 3 * n_pad,
            bytes_accessed=n_pad * d_pad * 2 + 16 * n_pad + 8),
    )(z_pad, cls_row, cls_col, zsq_pad, p1_arr)
    return out[0, 0]


# ---------------------------------------------------------------------------
# Pure-numpy reference (mirrors the PyTorch module exactly) for verification
# ---------------------------------------------------------------------------
def _reference_loss(emb_i, emb_j, predicted_cls, temperature=0.5, coeff=0.01):
    def normalize(x):
        return x / np.maximum(np.linalg.norm(x, axis=1, keepdims=True), 1e-12)

    zi = normalize(np.asarray(emb_i, dtype=np.float64))
    zj = normalize(np.asarray(emb_j, dtype=np.float64))

    def aug(a, b):
        r = np.concatenate([a, b], 0)
        n = r.shape[0]
        half = n // 2
        sim = r @ r.T
        pos = np.concatenate([np.diag(sim, half), np.diag(sim, -half)])
        num = np.exp(pos / temperature)
        den = ((1.0 - np.eye(n)) * np.exp(sim / temperature)).sum(1)
        return (-np.log(num / den)).sum() / (2 * n)

    loss1 = aug(zi, zj)
    keep = np.asarray(predicted_cls) != -1
    if keep.sum() == 0:
        return loss1
    r = np.concatenate([zi[keep], zj[keep]], 0)
    n = r.shape[0]
    sim = r @ r.T
    c = np.concatenate([np.asarray(predicted_cls)[keep]] * 2)
    same = (c[:, None] == c[None, :]).astype(np.float64)
    pos = (same - np.eye(n)) * sim
    neg = (1.0 - same) * sim
    num = np.exp(pos / temperature)
    den = np.exp(neg / temperature)
    lp = -np.log(num / den.sum(1)[None, :])
    loss2 = lp.sum() / (2 * n)
    return loss1 + coeff * loss2


if __name__ == "__main__":
    key = jax.random.PRNGKey(0)
    k1, k2 = jax.random.split(key)
    batch, dim = 8, 32
    emb_i = jax.random.normal(k1, (batch, dim), dtype=jnp.float32)
    emb_j = jax.random.normal(k2, (batch, dim), dtype=jnp.float32)
    # mix of labeled (classes 0/1) and unlabeled (-1) samples
    predicted_cls = jnp.array([0, 1, -1, 0, -1, 1, -1, -1], dtype=jnp.int32)

    loss_fn = jax.jit(contrastive_loss)            # fully on-device / traceable
    loss = jax.block_until_ready(loss_fn(emb_i, emb_j, predicted_cls))
    ref = _reference_loss(np.asarray(emb_i), np.asarray(emb_j), np.asarray(predicted_cls))
    assert np.isclose(float(loss), float(ref), rtol=2e-2, atol=2e-2), (float(loss), float(ref))

    # all-unlabeled path: loss2 must be exactly 0 (no NaNs), same compiled kernel
    cls_none = jnp.full((batch,), -1, dtype=jnp.int32)
    loss_u = jax.block_until_ready(loss_fn(emb_i, emb_j, cls_none))
    ref_u = _reference_loss(np.asarray(emb_i), np.asarray(emb_j), np.asarray(cls_none))
    assert np.isclose(float(loss_u), float(ref_u), rtol=2e-2, atol=2e-2), (float(loss_u), float(ref_u))

    print("KERNEL_OK")
</pallas_src>

<mosaic_0001>
module attributes {stable_mosaic.version = 11 : i64} {
  func.func @_fused_loss_kernel(%arg0: i32, %arg1: memref<16x128xbf16, #tpu.memory_space<vmem>>, %arg2: memref<1x16xi32, #tpu.memory_space<vmem>>, %arg3: memref<16x1xi32, #tpu.memory_space<vmem>>, %arg4: memref<1x16xf32, #tpu.memory_space<vmem>>, %arg5: memref<1x1xf32, #tpu.memory_space<vmem>>, %arg6: memref<1x1xf32, #tpu.memory_space<vmem>>, %arg7: memref<1x16xf32, #tpu.memory_space<vmem>>, %arg8: memref<1x16xf32, #tpu.memory_space<vmem>>, %arg9: memref<1x16xf32, #tpu.memory_space<vmem>>) attributes {dimension_semantics = [#tpu.dimension_semantics<arbitrary>], iteration_bounds = array<i64: 1>, scalar_prefetch = 0 : i64, scratch_operands = 3 : i64, tpu.core_type = #tpu.core_type<tc>, window_params = [{pipeline_mode = #tpu.pipeline_mode<synchronous>, transform_indices = @transform_0, window_bounds = array<i64: 16, 128>}, {pipeline_mode = #tpu.pipeline_mode<synchronous>, transform_indices = @transform_1, window_bounds = array<i64: 1, 16>}, {pipeline_mode = #tpu.pipeline_mode<synchronous>, transform_indices = @transform_2, window_bounds = array<i64: 16, 1>}, {pipeline_mode = #tpu.pipeline_mode<synchronous>, transform_indices = @transform_3, window_bounds = array<i64: 1, 16>}, {pipeline_mode = #tpu.pipeline_mode<synchronous>, transform_indices = @transform_4, window_bounds = array<i64: 1, 1>}, {pipeline_mode = #tpu.pipeline_mode<synchronous>, transform_indices = @transform_5, window_bounds = array<i64: 1, 1>}]} {
    %c0_i32 = arith.constant 0 : i32
    %0 = arith.cmpi eq, %arg0, %c0_i32 : i32
    %1 = arith.extui %0 : i1 to i32
    %c0_i32_0 = arith.constant 0 : i32
    %2 = arith.cmpi ne, %1, %c0_i32_0 : i32
    scf.if %2 {
      %cst_29 = arith.constant 0.000000e+00 : f32
      %48 = vector.broadcast %cst_29 : f32 to vector<1x16xf32>
      %c0_30 = arith.constant 0 : index
      %c0_31 = arith.constant 0 : index
      %49 = vector.load %arg7[%c0_30, %c0_31] : memref<1x16xf32, #tpu.memory_space<vmem>>, vector<1x16xf32>
      tpu.vector_store %arg7[%c0_30, %c0_31], %48 {strides = array<i32>} : memref<1x16xf32, #tpu.memory_space<vmem>>, vector<1x16xf32>,
      %cst_32 = arith.constant 0.000000e+00 : f32
      %50 = vector.broadcast %cst_32 : f32 to vector<1x16xf32>
      %c0_33 = arith.constant 0 : index
      %c0_34 = arith.constant 0 : index
      %51 = vector.load %arg8[%c0_33, %c0_34] : memref<1x16xf32, #tpu.memory_space<vmem>>, vector<1x16xf32>
      tpu.vector_store %arg8[%c0_33, %c0_34], %50 {strides = array<i32>} : memref<1x16xf32, #tpu.memory_space<vmem>>, vector<1x16xf32>,
      %cst_35 = arith.constant 0.000000e+00 : f32
      %52 = vector.broadcast %cst_35 : f32 to vector<1x16xf32>
      %c0_36 = arith.constant 0 : index
      %c0_37 = arith.constant 0 : index
      %53 = vector.load %arg9[%c0_36, %c0_37] : memref<1x16xf32, #tpu.memory_space<vmem>>, vector<1x16xf32>
      tpu.vector_store %arg9[%c0_36, %c0_37], %52 {strides = array<i32>} : memref<1x16xf32, #tpu.memory_space<vmem>>, vector<1x16xf32>,
    } else {
    }
    %c16_i32 = arith.constant 16 : i32
    %3 = arith.muli %arg0, %c16_i32 : i32
    %4 = tpu.assume_multiple %3, 8 : i32
    %5 = arith.index_cast %4 : i32 to index
    %c0 = arith.constant 0 : index
    %6 = vector.load %arg1[%5, %c0] : memref<16x128xbf16, #tpu.memory_space<vmem>>, vector<16x128xbf16>
    %c0_1 = arith.constant 0 : index
    %c0_2 = arith.constant 0 : index
    %7 = vector.load %arg1[%c0_1, %c0_2] : memref<16x128xbf16, #tpu.memory_space<vmem>>, vector<16x128xbf16>
    %cst = arith.constant dense<0.000000e+00> : vector<16x16xf32>
    %8 = tpu.matmul %6, %7, %cst {dimension_numbers = #tpu.dot_dimension_numbers<[1], [1], [0], [0], [0, 0, 1, 0], [], []>} : vector<16x128xbf16>, vector<16x128xbf16>, vector<16x16xf32> -> vector<16x16xf32>
    %9 = arith.index_cast %4 : i32 to index
    %c0_3 = arith.constant 0 : index
    %10 = vector.load %arg3[%9, %c0_3] : memref<16x1xi32, #tpu.memory_space<vmem>>, vector<16x1xi32>
    %c0_4 = arith.constant 0 : index
    %c0_5 = arith.constant 0 : index
    %11 = vector.load %arg2[%c0_4, %c0_5] : memref<1x16xi32, #tpu.memory_space<vmem>>, vector<1x16xi32>
    %12 = vector.broadcast %10 : vector<16x1xi32> to vector<16x16xi32>
    %13 = vector.broadcast %11 : vector<1x16xi32> to vector<16x16xi32>
    %14 = arith.cmpi eq, %12, %13 : vector<16x16xi32>
    %cst_6 = arith.constant 1.000000e+00 : f32
    %15 = vector.broadcast %cst_6 : f32 to vector<16x16xf32>
    %16 = arith.subf %8, %15 : vector<16x16xf32>
    %cst_7 = arith.constant 2.000000e+00 : f32
    %17 = vector.broadcast %cst_7 : f32 to vector<16x16xf32>
    %18 = arith.mulf %16, %17 : vector<16x16xf32>
    %19 = math.exp %18 : vector<16x16xf32>
    %c0_8 = arith.constant 0 : index
    %c0_9 = arith.constant 0 : index
    %20 = vector.load %arg7[%c0_8, %c0_9] : memref<1x16xf32, #tpu.memory_space<vmem>>, vector<1x16xf32>
    %cst_10 = arith.constant dense<0.000000e+00> : vector<16xf32>
    %21 = vector.multi_reduction <add>, %19, %cst_10 [0] : vector<16x16xf32> to vector<16xf32>
    %22 = vector.shape_cast %21 : vector<16xf32> to vector<1x16xf32>
    %23 = arith.addf %20, %22 : vector<1x16xf32>
    %c0_11 = arith.constant 0 : index
    %c0_12 = arith.constant 0 : index
    %24 = vector.load %arg7[%c0_11, %c0_12] : memref<1x16xf32, #tpu.memory_space<vmem>>, vector<1x16xf32>
    tpu.vector_store %arg7[%c0_11, %c0_12], %23 {strides = array<i32>} : memref<1x16xf32, #tpu.memory_space<vmem>>, vector<1x16xf32>,
    %cst_13 = arith.constant 0.135335281 : f32
    %25 = vector.broadcast %cst_13 : f32 to vector<16x16xf32>
    %26 = arith.select %14, %25, %19 : vector<16x16xi1>, vector<16x16xf32>
    %c0_14 = arith.constant 0 : index
    %c0_15 = arith.constant 0 : index
    %27 = vector.load %arg8[%c0_14, %c0_15] : memref<1x16xf32, #tpu.memory_space<vmem>>, vector<1x16xf32>
    %c0_i32_16 = arith.constant 0 : i32
    %28 = vector.broadcast %c0_i32_16 : i32 to vector<16x1xi32>
    %29 = arith.cmpi sge, %10, %28 : vector<16x1xi32>
    %cst_17 = arith.constant 0.000000e+00 : f32
    %30 = vector.shape_cast %29 : vector<16x1xi1> to vector<16x1xi1>
    %31 = vector.broadcast %30 : vector<16x1xi1> to vector<16x16xi1>
    %32 = vector.broadcast %cst_17 : f32 to vector<16x16xf32>
    %33 = arith.select %31, %26, %32 : vector<16x16xi1>, vector<16x16xf32>
    %cst_18 = arith.constant dense<0.000000e+00> : vector<16xf32>
    %34 = vector.multi_reduction <add>, %33, %cst_18 [0] : vector<16x16xf32> to vector<16xf32>
    %35 = vector.shape_cast %34 : vector<16xf32> to vector<1x16xf32>
    %36 = arith.addf %27, %35 : vector<1x16xf32>
    %c0_19 = arith.constant 0 : index
    %c0_20 = arith.constant 0 : index
    %37 = vector.load %arg8[%c0_19, %c0_20] : memref<1x16xf32, #tpu.memory_space<vmem>>, vector<1x16xf32>
    tpu.vector_store %arg8[%c0_19, %c0_20], %36 {strides = array<i32>} : memref<1x16xf32, #tpu.memory_space<vmem>>, vector<1x16xf32>,
    %c0_21 = arith.constant 0 : index
    %c0_22 = arith.constant 0 : index
    %38 = vector.load %arg9[%c0_21, %c0_22] : memref<1x16xf32, #tpu.memory_space<vmem>>, vector<1x16xf32>
    %cst_23 = arith.constant 0.000000e+00 : f32
    %39 = vector.broadcast %cst_23 : f32 to vector<16x16xf32>
    %40 = arith.select %14, %8, %39 : vector<16x16xi1>, vector<16x16xf32>
    %cst_24 = arith.constant dense<0.000000e+00> : vector<16xf32>
    %41 = vector.multi_reduction <add>, %40, %cst_24 [0] : vector<16x16xf32> to vector<16xf32>
    %42 = vector.shape_cast %41 : vector<16xf32> to vector<1x16xf32>
    %43 = arith.addf %38, %42 : vector<1x16xf32>
    %c0_25 = arith.constant 0 : index
    %c0_26 = arith.constant 0 : index
    %44 = vector.load %arg9[%c0_25, %c0_26] : memref<1x16xf32, #tpu.memory_space<vmem>>, vector<1x16xf32>
    tpu.vector_store %arg9[%c0_25, %c0_26], %43 {strides = array<i32>} : memref<1x16xf32, #tpu.memory_space<vmem>>, vector<1x16xf32>,
    %c0_i32_27 = arith.constant 0 : i32
    %45 = arith.cmpi eq, %arg0, %c0_i32_27 : i32
    %46 = arith.extui %45 : i1 to i32
    %c0_i32_28 = arith.constant 0 : i32
    %47 = arith.cmpi ne, %46, %c0_i32_28 : i32
    scf.if %47 {
      %c0_29 = arith.constant 0 : index
      %c0_30 = arith.constant 0 : index
      %48 = vector.load %arg2[%c0_29, %c0_30] : memref<1x16xi32, #tpu.memory_space<vmem>>, vector<1x16xi32>
      %c-2_i32 = arith.constant -2 : i32
      %49 = vector.broadcast %c-2_i32 : i32 to vector<1x16xi32>
      %50 = arith.cmpi sgt, %48, %49 : vector<1x16xi32>
      %c0_i32_31 = arith.constant 0 : i32
      %51 = vector.broadcast %c0_i32_31 : i32 to vector<1x16xi32>
      %52 = arith.cmpi sge, %48, %51 : vector<1x16xi32>
      %c0_32 = arith.constant 0 : index
      %c0_33 = arith.constant 0 : index
      %53 = vector.load %arg4[%c0_32, %c0_33] : memref<1x16xf32, #tpu.memory_space<vmem>>, vector<1x16xf32>
      %cst_34 = arith.constant 1.000000e+00 : f32
      %54 = vector.broadcast %cst_34 : f32 to vector<1x16xf32>
      %55 = arith.subf %53, %54 : vector<1x16xf32>
      %cst_35 = arith.constant 2.000000e+00 : f32
      %56 = vector.broadcast %cst_35 : f32 to vector<1x16xf32>
      %57 = arith.mulf %55, %56 : vector<1x16xf32>
      %58 = math.exp %57 : vector<1x16xf32>
      %c0_36 = arith.constant 0 : index
      %c0_37 = arith.constant 0 : index
      %59 = vector.load %arg7[%c0_36, %c0_37] : memref<1x16xf32, #tpu.memory_space<vmem>>, vector<1x16xf32>
      %60 = arith.subf %59, %58 : vector<1x16xf32>
      %cst_38 = arith.constant 0.000000e+00 : f32
      %61 = vector.broadcast %cst_38 : f32 to vector<1x16xf32>
      %62 = arith.subf %60, %61 : vector<1x16xf32>
      %cst_39 = arith.constant 1.000000e+00 : f32
      %63 = vector.broadcast %cst_39 : f32 to vector<1x16xf32>
      %64 = arith.select %50, %62, %63 : vector<1x16xi1>, vector<1x16xf32>
      %65 = math.log %64 : vector<1x16xf32>
      %c0_40 = arith.constant 0 : index
      %c0_41 = arith.constant 0 : index
      %66 = vector.load %arg5[%c0_40, %c0_41] : memref<1x1xf32, #tpu.memory_space<vmem>>, vector<1x1xf32>
      %cst_42 = arith.constant 1.600000e+01 : f32
      %67 = vector.broadcast %cst_42 : f32 to vector<1x1xf32>
      %68 = arith.subf %67, %66 : vector<1x1xf32>
      %cst_43 = arith.constant 2.000000e+00 : f32
      %69 = vector.broadcast %cst_43 : f32 to vector<1x1xf32>
      %70 = arith.mulf %69, %68 : vector<1x1xf32>
      %71 = vector.shape_cast %65 : vector<1x16xf32> to vector<1x1x16xf32>
      %cst_44 = arith.constant dense<0.000000e+00> : vector<1xf32>
      %72 = vector.multi_reduction <add>, %71, %cst_44 [1, 2] : vector<1x1x16xf32> to vector<1xf32>
      %73 = vector.shape_cast %72 : vector<1xf32> to vector<1x1x1xf32>
      %74 = vector.extract %73[0, 0, 0] : f32 from vector<1x1x1xf32>
      %75 = vector.broadcast %74 : f32 to vector<1x1xf32>
      %76 = arith.addf %70, %75 : vector<1x1xf32>
      %cst_45 = arith.constant 3.200000e+01 : f32
      %77 = vector.broadcast %cst_45 : f32 to vector<1x1xf32>
      %78 = arith.divf %76, %77 : vector<1x1xf32>
      %cst_46 = arith.constant 1.000000e+00 : f32
      %cst_47 = arith.constant 0.000000e+00 : f32
      %79 = vector.broadcast %cst_46 : f32 to vector<1x16xf32>
      %80 = vector.broadcast %cst_47 : f32 to vector<1x16xf32>
      %81 = arith.select %52, %79, %80 : vector<1x16xi1>, vector<1x16xf32>
      %82 = vector.shape_cast %81 : vector<1x16xf32> to vector<1x1x16xf32>
      %cst_48 = arith.constant dense<0.000000e+00> : vector<1xf32>
      %83 = vector.multi_reduction <add>, %82, %cst_48 [1, 2] : vector<1x1x16xf32> to vector<1xf32>
      %84 = vector.shape_cast %83 : vector<1xf32> to vector<1x1x1xf32>
      %85 = vector.extract %84[0, 0, 0] : f32 from vector<1x1x1xf32>
      %c0_49 = arith.constant 0 : index
      %c0_50 = arith.constant 0 : index
      %86 = vector.load %arg8[%c0_49, %c0_50] : memref<1x16xf32, #tpu.memory_space<vmem>>, vector<1x16xf32>
      %cst_51 = arith.constant 1.000000e+00 : f32
      %87 = vector.broadcast %cst_51 : f32 to vector<1x16xf32>
      %88 = arith.select %52, %86, %87 : vector<1x16xi1>, vector<1x16xf32>
      %89 = math.log %88 : vector<1x16xf32>
      %c0_52 = arith.constant 0 : index
      %c0_53 = arith.constant 0 : index
      %90 = vector.load %arg9[%c0_52, %c0_53] : memref<1x16xf32, #tpu.memory_space<vmem>>, vector<1x16xf32>
      %91 = arith.subf %90, %53 : vector<1x16xf32>
      %cst_54 = arith.constant 0.000000e+00 : f32
      %92 = vector.broadcast %cst_54 : f32 to vector<1x16xf32>
      %93 = arith.select %52, %91, %92 : vector<1x16xi1>, vector<1x16xf32>
      %94 = vector.shape_cast %93 : vector<1x16xf32> to vector<1x1x16xf32>
      %cst_55 = arith.constant dense<0.000000e+00> : vector<1xf32>
      %95 = vector.multi_reduction <add>, %94, %cst_55 [1, 2] : vector<1x1x16xf32> to vector<1xf32>
      %96 = vector.shape_cast %95 : vector<1xf32> to vector<1x1x1xf32>
      %97 = vector.extract %96[0, 0, 0] : f32 from vector<1x1x1xf32>
      %cst_56 = arith.constant 0.000000e+00 : f32
      %98 = arith.subf %cst_56, %97 : f32
      %cst_57 = arith.constant 2.000000e+00 : f32
      %99 = arith.mulf %98, %cst_57 : f32
      %cst_58 = arith.constant 2.000000e+00 : f32
      %100 = arith.mulf %85, %cst_58 : f32
      %101 = vector.shape_cast %89 : vector<1x16xf32> to vector<1x1x16xf32>
      %cst_59 = arith.constant dense<0.000000e+00> : vector<1xf32>
      %102 = vector.multi_reduction <add>, %101, %cst_59 [1, 2] : vector<1x1x16xf32> to vector<1xf32>
      %103 = vector.shape_cast %102 : vector<1xf32> to vector<1x1x1xf32>
      %104 = vector.extract %103[0, 0, 0] : f32 from vector<1x1x1xf32>
      %105 = arith.addf %100, %104 : f32
      %106 = arith.mulf %85, %105 : f32
      %107 = arith.addf %99, %106 : f32
      %cst_60 = arith.constant 2.000000e+00 : f32
      %108 = arith.mulf %cst_60, %85 : f32
      %cst_61 = arith.constant 1.000000e+00 : f32
      %109 = arith.maximumf %108, %cst_61 : f32
      %110 = arith.divf %107, %109 : f32
      %cst_62 = arith.constant 5.000000e-01 : f32
      %111 = arith.cmpf ogt, %85, %cst_62 : f32
      %cst_63 = arith.constant 0.000000e+00 : f32
      %112 = arith.select %111, %110, %cst_63 : f32
      %cst_64 = arith.constant 0.00999999977 : f32
      %113 = arith.mulf %cst_64, %112 : f32
      %114 = vector.broadcast %113 : f32 to vector<1x1xf32>
      %115 = arith.addf %78, %114 : vector<1x1xf32>
      %c0_65 = arith.constant 0 : index
      %c0_66 = arith.constant 0 : index
      %116 = vector.load %arg6[%c0_65, %c0_66] : memref<1x1xf32, #tpu.memory_space<vmem>>, vector<1x1xf32>
      tpu.vector_store %arg6[%c0_65, %c0_66], %115 {strides = array<i32>} : memref<1x1xf32, #tpu.memory_space<vmem>>, vector<1x1xf32>,
    } else {
    }
    return
  }
  func.func @transform_0(%arg0: i32) -> (i32, i32) {
    %c0_i32 = arith.constant 0 : i32
    %c0_i32_0 = arith.constant 0 : i32
    %c0_i32_1 = arith.constant 0 : i32
    return %c0_i32, %c0_i32_0 : i32, i32
  }
  func.func @transform_1(%arg0: i32) -> (i32, i32) {
    %c0_i32 = arith.constant 0 : i32
    %c0_i32_0 = arith.constant 0 : i32
    %c0_i32_1 = arith.constant 0 : i32
    return %c0_i32, %c0_i32_0 : i32, i32
  }
  func.func @transform_2(%arg0: i32) -> (i32, i32) {
    %c0_i32 = arith.constant 0 : i32
    %c0_i32_0 = arith.constant 0 : i32
    %c0_i32_1 = arith.constant 0 : i32
    return %c0_i32, %c0_i32_0 : i32, i32
  }
  func.func @transform_3(%arg0: i32) -> (i32, i32) {
    %c0_i32 = arith.constant 0 : i32
    %c0_i32_0 = arith.constant 0 : i32
    %c0_i32_1 = arith.constant 0 : i32
    return %c0_i32, %c0_i32_0 : i32, i32
  }
  func.func @transform_4(%arg0: i32) -> (i32, i32) {
    %c0_i32 = arith.constant 0 : i32
    %c0_i32_0 = arith.constant 0 : i32
    %c0_i32_1 = arith.constant 0 : i32
    return %c0_i32, %c0_i32_0 : i32, i32
  }
  func.func @transform_5(%arg0: i32) -> (i32, i32) {
    %c0_i32 = arith.constant 0 : i32
    %c0_i32_0 = arith.constant 0 : i32
    %c0_i32_1 = arith.constant 0 : i32
    return %c0_i32, %c0_i32_0 : i32, i32
  }
}

</mosaic_0001>

<bundles_post_ra>
// kernel: contrastive_loss.1
= control target key start
LH: loop header
LB: loop body
LE: loop exit
PB: predicated region body
PF: predicated region fallthrough
CT: control target
= control target key end

     0   :  { %s438_s0 = inlined_call_operand.vmem [shape: bf16[16,128], index: 0, kind: input, shape index: {}]   ;;  %s439_s1 = inlined_call_operand.vmem [shape: s32[1,16], index: 1, kind: input, shape index: {}]   ;;  %s440_s2 = inlined_call_operand.vmem [shape: s32[16,1], index: 2, kind: input, shape index: {}]   ;;  %s441_s3 = inlined_call_operand.vmem [shape: f32[1,16], index: 3, kind: input, shape index: {}]   ;;  %s442_s4 = inlined_call_operand.<no memory space> [shape: f32[1,1], index: 4, kind: input, shape index: {}]   ;;  %s443_s5 = inlined_call_operand.hbm [shape: f32[1,1], index: 5, kind: output, shape index: {}]  }
   0x1   :  { %v10_v0 = vstv %s442_s4 }
   0x2   :  { %11 = vst [vmem:[#allocation5] sm:$0x1] %v10_v0 }
   0x3   :  { %vm28_vm0 = vcmask 122880   ;;  %v346_v1 = vmov 0.0   ;;  %v310_v2 = vld [vmem:[%s438_s0] sm:$0xff]   ;;  %vm347_vm1 = vmmov 0   ;;  %v96_v4 = vld [vmem:[%s440_s2 + $0x8] sm:$0xff]  ;;  %v348_v5 = vmov 0  }
   0x4   :  { %29 = vst.msk [vmem:[#allocation2] sm:$0x1] %vm28_vm0, %v346_v1  ;;  %30 = vst.msk [vmem:[#allocation3] sm:$0x1] %vm28_vm0, %v346_v1  ;;  %287 = vmatprep.subr.bf16.mxu0 %v346_v1  ;;  %289 = vmatprep.mubr.msk.bf16.mxu0 %vm347_vm1, %v346_v1  ;;  %v95_v3 = vld [vmem:[%s440_s2] sm:$0xff]  ;;  %vm136_vm3 = vcmp.ge.s32.totalorder %v96_v4, 0 }
   0x5   :  { %31 = vst.msk [vmem:[#allocation4] sm:$0x1] %vm28_vm0, %v346_v1  ;;  %288 = vmatpush3.bf16.xpose.msra.mxu0 %v310_v2  ;;  %308 = vset.pattern.permute.xlu0 %v348_v5  ;;  %vm135_vm2 = vcmp.ge.s32.totalorder %v95_v3, 0 }
   0x6   :  { %12 = vsyncpa [#allocation7], 0  ;;  %99 = vperm.xlu0 %308, %v95_v3   ;;  %309 = vset.pattern.permute.xlu1 %v348_v5  ;;  %v137_v6 = vsel %vm135_vm2, 1, %v348_v5  ;;  %v311_v7 = vld [vmem:[%s438_s0] sm:$0xff]   ;;  %v138_v8 = vsel %vm136_vm3, 1, %v348_v5  ;;  %vm119_vm7 = vcmask 130048  }
   0x7   :  { %140 = vperm.xlu1 %309, %v137_v6   ;;  %v402_v9 = vld [vmem:[%s439_s1] sm:$0x1]  ;;  %s349_s7 = smov 1.0   ;;  %s350_s19 = smov [#allocation6]   ;;  %vm261_vm11 = vcmask 0  }
   0x8   :  { %vm179_vm4 = vcmp.ge.s32.totalorder %v402_v9, 0  ;;  %v281_v13 = vld [vmem:[%s439_s1] ss:$0 sm:$0xff]  ;;  %vm178_vm10 = vcmp.gt.s32.totalorder %v402_v9, 4294967294  ;;  %s269_s20 = sshll.u32 %s350_s19, 4  ;;  %s270_s20 = int_to_ptr.vmem [resolvable:$true] %s269_s20 }
   0x9   :  { %v207_v10 = vsel %vm179_vm4, 1.0, %v346_v1  ;;  %v180_v38 = vld [vmem:[%s441_s3] sm:$0x1]  ;;  %s324_s21 = scalar_lea.vmem %s270_s20, 16  ;;  %s328_s22 = scalar_lea.vmem %s270_s20, 32 }
   0xa   :  { %102 = vperm.xlu0 %308, %v96_v4   ;;  %v208_v11 = vsel %vm28_vm0, %v207_v10, 0.0  ;;  %v284_v43 = vadd.f32 -1.0, %v180_v38  ;;  %p325_p1 = scmp.ne.s32.totalorder %s270_s20, %s324_s21  ;;  %p329_p2 = scmp.lt.s32.totalorder %s270_s20, %s270_s20 }
   0xb   :  { %143 = vperm.xlu1 %309, %v138_v8   ;;  %v118_v1 = vld [vmem:[#allocation2] sm:$0x1]  ;;  %v134_v4 = vld [vmem:[#allocation3] sm:$0x1]  ;;  %p330_p3 = scmp.lt.s32.totalorder %s328_s22, %s324_s21 }
   0xc   :  { %290 = vmatmul.mubr.bf16.vlgmr.msra.gmra.mxu0 %v311_v7  ;;  %v160_v36 = vld [vmem:[#allocation4] sm:$0x1]  ;;  %v182_v51 = vmul.f32 2.0, %v284_v43 }
   0xd   :  { %p331_p4 = por %p330_p3, %p329_p2 }
   0xe   :  { %v183_v58 = vmul.f32 1.442695, %v182_v51 }
   0xf   :  { %p332_p5 = pnand %p331_p4, %p325_p1 }
  0x2f   :  { %209 = vadd.xlane.f32.xlu1 %v208_v11 }
  0x81   :  { %v100_v12 = vpop.permute.xlu0 %99 }
  0x82   :  { %vm108_vm5 = vcmp.eq.s32.totalorder %v100_v12, %v281_v13  ;;  %v141_v33 = vpop.permute.xlu1 %140 }
  0x83   :  { %vm145_vm8 = vcmp.eq.s32.totalorder %v141_v33, 1 }
  0x85   :  { %v103_v14 = vpop.permute.xlu0 %102 }
  0x86   :  { %vm109_vm6 = vcmp.eq.s32.totalorder %v103_v14, %v281_v13  ;;  %v144_v40 = vpop.permute.xlu1 %143 }
  0x87   :  { %vm146_vm9 = vcmp.eq.s32.totalorder %v144_v40, 1 }
  0xcc   :  { %v87_v15 = vpop.f32.mrf.mxu0 }
  0xcd   :  { %v282_v16 = vadd.f32 -1.0, %v87_v15  ;;  %v161_v19 = vsel %vm108_vm5, %v87_v15, 0.0 }
  0xce   :  { %v291_v17 = vpop.f32.mrf.mxu0  ;;  %v163_v24 = vsel %vm119_vm7, %v161_v19, 0.0 }
  0xcf   :  { %v112_v18 = vmul.f32 2.0, %v282_v16 }
  0xd0   :  { %v90_v20 = vpop.f32.mrf.mxu0 }
  0xd1   :  { %v114_v21 = vmul.f32 1.442695, %v112_v18  ;;  %v283_v22 = vadd.f32 -1.0, %v90_v20  ;;  %v162_v23 = vsel %vm109_vm6, %v90_v20, 0.0 }
  0xd2   :  { %v164_v25 = vsel %vm119_vm7, %v162_v23, 0.0  ;;  %v292_v26 = vpop.f32.mrf.mxu0 }
  0xd3   :  { %312 = vpow2.f32 %v114_v21  ;;  %v113_v27 = vmul.f32 2.0, %v283_v22  ;;  %v165_v28 = vadd.f32 %v164_v25, %v163_v24  ;;  %v210_v25 = vpop.xlane.xlu1 %209 }
  0xd4   :  { %v211_v26 = vrot.slane %v210_v25, 4 }
  0xd5   :  { %v116_v29 = vmul.f32 1.442695, %v113_v27  ;;  %v166_v30 = vrot.slane %v165_v28, 4 }
  0xd6   :  { %v212_v27 = vadd.f32 %v211_v26, %v210_v25 }
  0xd7   :  { %314 = vpow2.f32 %v116_v29  ;;  %v167_v31 = vadd.f32 %v166_v30, %v165_v28 }
  0xd8   :  { %316 = vpow2.f32 %v183_v58  ;;  %v213_v28 = vrot.slane %v212_v27, 2 }
  0xd9   :  { %v168_v32 = vrot.slane %v167_v31, 2 }
  0xdb   :  { %v169_v34 = vadd.f32 %v168_v32, %v167_v31  ;;  %v214_v32 = vadd.f32 %v213_v28, %v212_v27 }
  0xdd   :  { %v170_v35 = vrot.slane %v169_v34, 1 }
  0xdf   :  { %v171_v37 = vadd.f32 %v170_v35, %v169_v34 }
  0xe0   :  { %v313_v39 = vpop.eup %312 }
  0xe1   :  { %v172_v41 = vadd.f32 %v171_v37, %v160_v36  ;;  %v132_v42 = vsel %vm108_vm5, 0.13533528, %v313_v39  ;;  %v120_v46 = vsel %vm119_vm7, %v313_v39, 0.0 }
  0xe2   :  { %v147_v45 = vsel %vm145_vm8, %v132_v42, 0.0 }
  0xe3   :  { %173 = vst.msk [vmem:[#allocation4] sm:$0x1] %vm28_vm0, %v172_v41  ;;  %v149_v52 = vsel %vm119_vm7, %v147_v45, 0.0 }
  0xe4   :  { %v315_v44 = vpop.eup %314 }
  0xe5   :  { %v121_v47 = vsel %vm119_vm7, %v315_v44, 0.0  ;;  %v133_v48 = vsel %vm109_vm6, 0.13533528, %v315_v44  ;;  %v317_v8 = vpop.eup %316 }
  0xe6   :  { %v122_v49 = vadd.f32 %v121_v47, %v120_v46  ;;  %v148_v50 = vsel %vm146_vm9, %v133_v48, 0.0 }
  0xe7   :  { %v150_v53 = vsel %vm119_vm7, %v148_v50, 0.0 }
  0xe8   :  { %v123_v54 = vrot.slane %v122_v49, 4  ;;  %v151_v55 = vadd.f32 %v150_v53, %v149_v52 }
  0xea   :  { %v124_v56 = vadd.f32 %v123_v54, %v122_v49  ;;  %v152_v57 = vrot.slane %v151_v55, 4  ;;  %v222_v15 = vld [vmem:[#allocation4] sm:$0x1]  ;;  %v190_v54 = vld [vmem:[#allocation5] sm:$0x1] }
  0xeb   :  { %v223_v17 = vsub.f32 %v222_v15, %v180_v38  ;;  %v215_v38 = vrot.slane %v214_v32, 1 }
  0xec   :  { %v125_v59 = vrot.slane %v124_v56, 2  ;;  %v153_v60 = vadd.f32 %v152_v57, %v151_v55  ;;  %v191_v55 = vsub.f32 16.0, %v190_v54 }
  0xed   :  { %v224_v21 = vsel %vm179_vm4, %v223_v17, 0.0  ;;  %v216_v45 = vadd.f32 %v215_v38, %v214_v32 }
  0xee   :  { %v126_v61 = vadd.f32 %v125_v59, %v124_v56  ;;  %v154_v62 = vrot.slane %v153_v60, 2  ;;  %v225_v22 = vsel %vm28_vm0, %v224_v21, 0.0  ;;  %v192_v56 = vmul.f32 2.0, %v191_v55 }
  0xf0   :  { %v127_v63 = vrot.slane %v126_v61, 1  ;;  %v155_v0 = vadd.f32 %v154_v62, %v153_v60 }
  0xf2   :  { %v128_v2 = vadd.f32 %v127_v63, %v126_v61  ;;  %v156_v3 = vrot.slane %v155_v0, 1 }
  0xf4   :  { %v129_v5 = vadd.f32 %v128_v2, %v118_v1  ;;  %v157_v6 = vadd.f32 %v156_v3, %v155_v0 }
  0xf6   :  { %131 = vst.msk [vmem:[#allocation2] sm:$0x1] %vm28_vm0, %v129_v5  ;;  %v158_v7 = vadd.f32 %v157_v6, %v134_v4 }
  0xf8   :  { %159 = vst.msk [vmem:[#allocation3] sm:$0x1] %vm28_vm0, %v158_v7 }
  0xfd   :  { %v185_v10 = vld [vmem:[#allocation2] sm:$0x1] }
  0xfe   :  { %v186_v11 = vsub.f32 %v185_v10, %v317_v8 }
  0xff   :  { %v218_v12 = vld [vmem:[#allocation3] sm:$0x1] }
 0x100   :  { %v187_v13 = vsel %vm178_vm10, %v186_v11, 1.0  ;;  %v219_v14 = vsel %vm179_vm4, %v218_v12, 1.0 }
 0x101   :  { %318 = vlog2.f32 %v187_v13 }
 0x102   :  { %320 = vlog2.f32 %v219_v14 }
 0x10e   :  { %v319_v16 = vpop.eup %318 }
 0x10f   :  { %v189_v18 = vmul.f32 0.6931472, %v319_v16  ;;  %v321_v20 = vpop.eup %320 }
 0x110   :  { %v221_v23 = vmul.f32 0.6931472, %v321_v20 }
 0x111   :  { %v193_v19 = vsel %vm28_vm0, %v189_v18, 0.0 }
 0x112   :  { %194 = vadd.xlane.f32.xlu0 %v193_v19  ;;  %v238_v24 = vsel %vm28_vm0, %v221_v23, 0.0 }
 0x116   :  { %226 = vadd.xlane.f32.xlu0 %v225_v22 }
 0x11a   :  { %239 = vadd.xlane.f32.xlu0 %v238_v24 }
 0x19b   :  { %v195_v29 = vpop.xlane.xlu0 %194 }
 0x19c   :  { %v196_v30 = vrot.slane %v195_v29, 4 }
 0x19e   :  { %v197_v31 = vadd.f32 %v196_v30, %v195_v29 }
 0x19f   :  { %v227_v33 = vpop.xlane.xlu0 %226 }
 0x1a0   :  { %v198_v34 = vrot.slane %v197_v31, 2  ;;  %v228_v35 = vrot.slane %v227_v33, 4 }
 0x1a2   :  { %v229_v9 = vadd.f32 %v228_v35, %v227_v33  ;;  %v199_v36 = vadd.f32 %v198_v34, %v197_v31 }
 0x1a3   :  { %v240_v37 = vpop.xlane.xlu0 %239 }
 0x1a4   :  { %v230_v39 = vrot.slane %v229_v9, 2  ;;  %v241_v40 = vrot.slane %v240_v37, 4  ;;  %v200_v41 = vrot.slane %v199_v36, 1 }
 0x1a6   :  { %v242_v42 = vadd.f32 %v241_v40, %v240_v37  ;;  %v201_v43 = vadd.f32 %v200_v41, %v199_v36  ;;  %v231_v44 = vadd.f32 %v230_v39, %v229_v9 }
 0x1a8   :  { %v243_v46 = vrot.slane %v242_v42, 2  ;;  %293 = vpush %v201_v43  ;;  %v232_v47 = vrot.slane %v231_v44, 1 }
 0x1a9   :  { %295 = vpush %v216_v45 }
 0x1aa   :  { %v244_v48 = vadd.f32 %v243_v46, %v242_v42  ;;  %v233_v49 = vadd.f32 %v232_v47, %v231_v44 }
 0x1ac   :  { %297 = vpush %v233_v49  ;;  %v245_v50 = vrot.slane %v244_v48, 1 }
 0x1ae   :  { %v246_v51 = vadd.f32 %v245_v50, %v244_v48 }
 0x1b0   :  { %299 = vpush %v246_v51 }
 0x1d9   :  { %s294_s3 = spop %293 }
 0x1da   :  { %s296_s30 = spop %295  ;;  %v203_v57 = vstv %s294_s3 }
 0x1db   :  { %s237_s6 = smul.f32 2.0, %s296_s30  ;;  %p256_p0 = scmp.gt.f32.partialorder %s296_s30, 0.5  ;;  %v204_v58 = vadd.f32 %v203_v57, %v192_v56 }
 0x1dd   :  { %s251_s8 = smax.f32 %s349_s7, %s237_s6  ;;  %s298_s9 = spop %297  ;;  %v206_v59 = vmul.f32 0.03125, %v204_v58 }
 0x1de   :  { %v252_v52 = vstv %s251_s8  ;;  %s235_s12 = ssub.f32 0.0, %s298_s9 }
 0x1df   :  { %322 = vrcp.f32 %v252_v52 }
 0x1e0   :  { %s236_s14 = smul.f32 2.0, %s235_s12 }
 0x1e1   :  { %s300_s10 = spop %299 }
 0x1e2   :  { %s248_s11 = sadd.f32 %s300_s10, %s237_s6 }
 0x1e4   :  { %s249_s13 = smul.f32 %s296_s30, %s248_s11 }
 0x1e6   :  { %s250_s15 = sadd.f32 %s249_s13, %s236_s14 }
 0x1ec   :  { %v323_v53 = vpop.eup %322 }
 0x1ed   :  { %301 = vpush %v323_v53 }
 0x21e   :  { %s302_s16 = spop %301 }
 0x21f   :  { %s255_s17 = smul.f32 %s302_s16, %s250_s15 }
 0x221   :  { %s445_s17 = smov (!%p256_p0, %s255_s17), 0.0 }
 0x222   :  { %s258_s18 = smul.f32 0.01, %s445_s17 }
 0x224   :  { %v259_v60 = vstv %s258_s18 }
 0x225   :  { %v260_v61 = vadd.f32 %v259_v60, %v206_v59 }
 0x227   :  { %262 = vst.msk [vmem:[#allocation6] sm:$0x1] %vm261_vm11, %v260_v61 }
 0x228   :  { %335 = shalt.err (!%p332_p5)
}
 0x229   :  { %272 = dma.vmem_to_hbm [thread:$0]  %s270_s20, 16, %s443_s5, [#allocation7]  }
 0x22a   :  { %344 = dma.done.wait [#allocation7], 16  }
 0x22b   :  { %345 = vsyncadd [#allocation7], 4294967280 }
 0x22c   :  { %276 = vsyncpa [#allocation7], 1 }

</bundles_post_ra>
